<compile_context>
chip_gen: v7x
topology: tpu7x:2x2x1
jax: 0.10.0
libtpu: 0.0.40
codegen_flags: <defaults>
</compile_context>

<pallas_src>
import numpy as np
import jax
import jax.numpy as jnp
from jax.experimental import pallas as pl
from jax.experimental.pallas import tpu as pltpu


def _res_out(resolution: int, stride: int) -> int:
    return len(range(0, resolution, stride))


def _pick_block_b(B: int, target: int = 8) -> int:
    """Largest divisor of B that is <= target (batches per grid step)."""
    bb = 1
    for d in range(1, min(B, target) + 1):
        if B % d == 0:
            bb = d
    return bb


def _subsample_with_cls(x, stride, resolution, block_b):
    B, N, C = x.shape
    ro = _res_out(resolution, stride)
    M = 1 + ro * ro

    def kernel(x_ref, o_ref):
        # x_ref: (Bt, N, C), o_ref: (Bt, M, C); all offsets are static.
        o_ref[:, 0:1, :] = x_ref[:, 0:1, :]                       # cls token
        for r in range(ro):                                       # kept rows (static unroll)
            src = 1 + r * stride * resolution
            dst = 1 + r * ro
            o_ref[:, pl.ds(dst, ro), :] = (
                x_ref[:, pl.ds(src, ro, stride=stride), :])       # kept cols

    return pl.pallas_call(
        kernel,
        out_shape=jax.ShapeDtypeStruct((B, M, C), x.dtype),
        grid=(B // block_b,),
        in_specs=[pl.BlockSpec((block_b, N, C), lambda b: (b, 0, 0))],
        out_specs=pl.BlockSpec((block_b, M, C), lambda b: (b, 0, 0)),
        compiler_params=pltpu.CompilerParams(
            dimension_semantics=("parallel",)),
    )(x)


def _subsample_no_cls(x, stride, resolution, block_b):
    B, N, C = x.shape
    ro = _res_out(resolution, stride)
    x4 = x.reshape(B, resolution, resolution, C)   # free reshape, no copy

    def kernel(x_ref, o_ref):
        # x_ref: (Bt, 1, res, C) = one *kept* spatial row; o_ref: (Bt, 1, ro, C)
        o_ref[...] = x_ref[:, :, pl.ds(0, ro, stride=stride), :]

    out4 = pl.pallas_call(
        kernel,
        out_shape=jax.ShapeDtypeStruct((B, ro, ro, C), x.dtype),
        grid=(B // block_b, ro),
        in_specs=[pl.BlockSpec((block_b, 1, resolution, C),
                               lambda b, r: (b, r * stride, 0, 0))],
        out_specs=pl.BlockSpec((block_b, 1, ro, C),
                               lambda b, r: (b, r, 0, 0)),
        compiler_params=pltpu.CompilerParams(
            dimension_semantics=("parallel", "parallel")),
    )(x4)
    return out4.reshape(B, ro * ro, C)


def subsample(x: jax.Array, stride: int, resolution: int,
              with_cls: bool = True, block_b=None) -> jax.Array:
    """Pallas implementation of Subsample.forward."""
    B, N, C = x.shape
    if with_cls:
        if N != 1 + resolution * resolution:
            raise ValueError(f"expected N == 1 + resolution^2, got {N}")
    else:
        if N != resolution * resolution:
            raise ValueError(f"expected N == resolution^2, got {N}")
    bb = _pick_block_b(B) if block_b is None else block_b
    if B % bb != 0:
        raise ValueError("block_b must divide B")
    if with_cls:
        return _subsample_with_cls(x, stride, resolution, bb)
    return _subsample_no_cls(x, stride, resolution, bb)


def subsample_ref(x: jax.Array, stride: int, resolution: int,
                  with_cls: bool = True) -> jax.Array:
    """Pure-JAX reference mirroring the PyTorch module."""
    B, N, C = x.shape
    if with_cls:
        x1 = x[:, 1:, :].reshape(B, resolution, resolution, C)
        x1 = x1[:, ::stride, ::stride].reshape(B, -1, C)
        return jnp.concatenate((x[:, :1, :], x1), axis=1)
    x1 = x.reshape(B, resolution, resolution, C)
    return x1[:, ::stride, ::stride].reshape(B, -1, C)


if __name__ == "__main__":
    key = jax.random.PRNGKey(0)
    k1, k2, k3 = jax.random.split(key, 3)

    # Config 1: B=2, resolution=8, stride=2, C=128 (lane-dense channel axis).
    B, resolution, stride, C = 2, 8, 2, 128
    N = 1 + resolution * resolution

    x_cls = jax.random.normal(k1, (B, N, C), dtype=jnp.float32)
    out = jax.block_until_ready(subsample(x_cls, stride, resolution, with_cls=True))
    ref = subsample_ref(x_cls, stride, resolution, with_cls=True)
    np.testing.assert_allclose(np.asarray(out), np.asarray(ref), rtol=0, atol=0)

    x_nocls = jax.random.normal(k2, (B, resolution * resolution, C), dtype=jnp.float32)
    out2 = jax.block_until_ready(subsample(x_nocls, stride, resolution, with_cls=False))
    ref2 = subsample_ref(x_nocls, stride, resolution, with_cls=False)
    np.testing.assert_allclose(np.asarray(out2), np.asarray(ref2), rtol=0, atol=0)

    # Config 2: odd resolution (exercises the ceil(res/stride) path), with cls.
    B2, res2, stride2, C2 = 2, 7, 2, 128
    x3 = jax.random.normal(k3, (B2, 1 + res2 * res2, C2), dtype=jnp.float32)
    out3 = jax.block_until_ready(subsample(x3, stride2, res2, with_cls=True))
    ref3 = subsample_ref(x3, stride2, res2, with_cls=True)
    np.testing.assert_allclose(np.asarray(out3), np.asarray(ref3), rtol=0, atol=0)

    print("KERNEL_OK")
</pallas_src>

<mosaic_0001>
module attributes {stable_mosaic.version = 11 : i64} {
  func.func @kernel(%arg0: i32, %arg1: memref<2x65x128xf32, #tpu.memory_space<vmem>>, %arg2: memref<2x17x128xf32, #tpu.memory_space<vmem>>) attributes {dimension_semantics = [#tpu.dimension_semantics<parallel>], iteration_bounds = array<i64: 1>, scalar_prefetch = 0 : i64, scratch_operands = 0 : i64, tpu.core_type = #tpu.core_type<tc>, window_params = [{transform_indices = @transform_0, window_bounds = array<i64: 2, 65, 128>}, {transform_indices = @transform_1, window_bounds = array<i64: 2, 17, 128>}]} {
    %c0 = arith.constant 0 : index
    %c0_0 = arith.constant 0 : index
    %c0_1 = arith.constant 0 : index
    %0 = vector.load %arg1[%c0, %c0_0, %c0_1] : memref<2x65x128xf32, #tpu.memory_space<vmem>>, vector<2x1x128xf32>
    %c0_2 = arith.constant 0 : index
    %c0_3 = arith.constant 0 : index
    %c0_4 = arith.constant 0 : index
    %1 = vector.load %arg2[%c0_2, %c0_3, %c0_4] : memref<2x17x128xf32, #tpu.memory_space<vmem>>, vector<2x1x128xf32>
    tpu.vector_store %arg2[%c0_2, %c0_3, %c0_4], %0 {strides = array<i32>} : memref<2x17x128xf32, #tpu.memory_space<vmem>>, vector<2x1x128xf32>,
    %c0_5 = arith.constant 0 : index
    %c1 = arith.constant 1 : index
    %c0_6 = arith.constant 0 : index
    %2 = tpu.strided_load %arg1[%c0_5, %c1, %c0_6] {strides = array<i32: 1, 2, 1>} : memref<2x65x128xf32, #tpu.memory_space<vmem>>, vector<2x4x128xf32>
    %c0_7 = arith.constant 0 : index
    %c1_8 = arith.constant 1 : index
    %c0_9 = arith.constant 0 : index
    %3 = vector.load %arg2[%c0_7, %c1_8, %c0_9] : memref<2x17x128xf32, #tpu.memory_space<vmem>>, vector<2x4x128xf32>
    tpu.vector_store %arg2[%c0_7, %c1_8, %c0_9], %2 {strides = array<i32>} : memref<2x17x128xf32, #tpu.memory_space<vmem>>, vector<2x4x128xf32>,
    %c0_10 = arith.constant 0 : index
    %c17 = arith.constant 17 : index
    %c0_11 = arith.constant 0 : index
    %4 = tpu.strided_load %arg1[%c0_10, %c17, %c0_11] {strides = array<i32: 1, 2, 1>} : memref<2x65x128xf32, #tpu.memory_space<vmem>>, vector<2x4x128xf32>
    %c0_12 = arith.constant 0 : index
    %c5 = arith.constant 5 : index
    %c0_13 = arith.constant 0 : index
    %5 = vector.load %arg2[%c0_12, %c5, %c0_13] : memref<2x17x128xf32, #tpu.memory_space<vmem>>, vector<2x4x128xf32>
    tpu.vector_store %arg2[%c0_12, %c5, %c0_13], %4 {strides = array<i32>} : memref<2x17x128xf32, #tpu.memory_space<vmem>>, vector<2x4x128xf32>,
    %c0_14 = arith.constant 0 : index
    %c33 = arith.constant 33 : index
    %c0_15 = arith.constant 0 : index
    %6 = tpu.strided_load %arg1[%c0_14, %c33, %c0_15] {strides = array<i32: 1, 2, 1>} : memref<2x65x128xf32, #tpu.memory_space<vmem>>, vector<2x4x128xf32>
    %c0_16 = arith.constant 0 : index
    %c9 = arith.constant 9 : index
    %c0_17 = arith.constant 0 : index
    %7 = vector.load %arg2[%c0_16, %c9, %c0_17] : memref<2x17x128xf32, #tpu.memory_space<vmem>>, vector<2x4x128xf32>
    tpu.vector_store %arg2[%c0_16, %c9, %c0_17], %6 {strides = array<i32>} : memref<2x17x128xf32, #tpu.memory_space<vmem>>, vector<2x4x128xf32>,
    %c0_18 = arith.constant 0 : index
    %c49 = arith.constant 49 : index
    %c0_19 = arith.constant 0 : index
    %8 = tpu.strided_load %arg1[%c0_18, %c49, %c0_19] {strides = array<i32: 1, 2, 1>} : memref<2x65x128xf32, #tpu.memory_space<vmem>>, vector<2x4x128xf32>
    %c0_20 = arith.constant 0 : index
    %c13 = arith.constant 13 : index
    %c0_21 = arith.constant 0 : index
    %9 = vector.load %arg2[%c0_20, %c13, %c0_21] : memref<2x17x128xf32, #tpu.memory_space<vmem>>, vector<2x4x128xf32>
    tpu.vector_store %arg2[%c0_20, %c13, %c0_21], %8 {strides = array<i32>} : memref<2x17x128xf32, #tpu.memory_space<vmem>>, vector<2x4x128xf32>,
    return
  }
  func.func @transform_0(%arg0: i32) -> (i32, i32, i32) {
    %c0_i32 = arith.constant 0 : i32
    %c0_i32_0 = arith.constant 0 : i32
    %c0_i32_1 = arith.constant 0 : i32
    return %arg0, %c0_i32, %c0_i32_0 : i32, i32, i32
  }
  func.func @transform_1(%arg0: i32) -> (i32, i32, i32) {
    %c0_i32 = arith.constant 0 : i32
    %c0_i32_0 = arith.constant 0 : i32
    %c0_i32_1 = arith.constant 0 : i32
    return %arg0, %c0_i32, %c0_i32_0 : i32, i32, i32
  }
}

</mosaic_0001>

<bundles_post_ra>
// kernel: tpu_custom_call.1
= control target key start
LH: loop header
LB: loop body
LE: loop exit
PB: predicated region body
PF: predicated region fallthrough
CT: control target
= control target key end

     0   :  { %s118_s0 = inlined_call_operand.vmem [shape: f32[2,65,128], index: 0, kind: input, shape index: {}]   ;;  %s119_s1 = inlined_call_operand.vmem [shape: f32[2,17,128], index: 1, kind: output, shape index: {}]  }
   0x1   :  { %v8_v0 = vld [vmem:[%s118_s0] sm:$0x1]  ;;  %v9_v1 = vld [vmem:[%s118_s0 + $0x48] sm:$0x1] }
   0x2   :  { %10 = vst [vmem:[%s119_s1] sm:$0x1] %v8_v0  ;;  %11 = vst [vmem:[%s119_s1 + $0x18] sm:$0x1] %v9_v1  ;;  %v40_v2 = vld [vmem:[%s118_s0 + $0x1] ss:$2 sm:$0xf] }
   0x3   :  { %v41_v3 = vld [vmem:[%s118_s0 + $0x49] ss:$2 sm:$0xf]  ;;  %16 = vst [vmem:[%s119_s1 + $0x1] sm:$0xf] %v40_v2 }
   0x4   :  { %17 = vst [vmem:[%s119_s1 + $0x19] sm:$0xf] %v41_v3  ;;  %v42_v4 = vld [vmem:[%s118_s0 + $0x11] ss:$2 sm:$0xf] }
   0x5   :  { %v43_v5 = vld [vmem:[%s118_s0 + $0x59] ss:$2 sm:$0xf]  ;;  %22 = vst [vmem:[%s119_s1 + $0x5] sm:$0xf] %v42_v4 }
   0x6   :  { %23 = vst [vmem:[%s119_s1 + $0x1d] sm:$0xf] %v43_v5  ;;  %v44_v6 = vld [vmem:[%s118_s0 + $0x21] ss:$2 sm:$0xf] }
   0x7   :  { %v45_v7 = vld [vmem:[%s118_s0 + $0x69] ss:$2 sm:$0xf]  ;;  %28 = vst [vmem:[%s119_s1 + $0x9] sm:$0xf] %v44_v6 }
   0x8   :  { %29 = vst [vmem:[%s119_s1 + $0x21] sm:$0xf] %v45_v7  ;;  %v46_v8 = vld [vmem:[%s118_s0 + $0x31] ss:$2 sm:$0xf] }
   0x9   :  { %v47_v9 = vld [vmem:[%s118_s0 + $0x79] ss:$2 sm:$0xf]  ;;  %34 = vst [vmem:[%s119_s1 + $0xd] sm:$0xf] %v46_v8 }
   0xa   :  { %35 = vst [vmem:[%s119_s1 + $0x25] sm:$0xf] %v47_v9 }

</bundles_post_ra>
